<compile_context>
chip_gen: v6e
topology: v6e:2x2x1
jax: 0.10.0
libtpu: 0.0.40
codegen_flags: <defaults>
</compile_context>

<pallas_src>
import math

import jax
import jax.numpy as jnp
from jax import lax
from jax.experimental import pallas as pl
from jax.experimental.pallas import tpu as pltpu


def _make_attn_kernel(*, hidden_pad: int, seq: int, tb: int, inv_scale: float):
    HP, S, Tb = hidden_pad, seq, tb
    R = Tb * S  # packed rows per grid step

    def attn_kernel(x_ref, w_ref, b_ref, o_ref):
        # x_ref: (R, D) rows for Tb batch elements; w_ref: (D, 3*HP); b_ref: (1, 3*HP)
        x = x_ref[...]
        w = w_ref[...]
        b = b_ref[...]

        # Fused Q/K/V projection: one MXU matmul, f32 accumulation.
        qkv = jnp.dot(x, w, preferred_element_type=jnp.float32) + b  # (R, 3*HP)

        # Lane-tile-aligned segment slices (each segment is exactly HP = 128 lanes).
        q = qkv[:, 0:HP]            # (R, HP)
        k = qkv[:, HP:2 * HP]       # (R, HP)
        v = qkv[:, 2 * HP:3 * HP]   # (R, HP)

        # Block-diagonal scores: contract the HP axis of q and k directly (no k.T
        # materialized).  Zero-padded lanes contribute 0.
        s = lax.dot_general(
            q, k,
            dimension_numbers=(((1,), (1,)), ((), ())),
            preferred_element_type=jnp.float32,
        ) * inv_scale               # (R, R)

        if Tb > 1:
            # Mask cross-batch score blocks BEFORE the row-max so each row's softmax is
            # exactly the per-batch softmax.
            row_b = lax.broadcasted_iota(jnp.int32, (R, R), 0) // S
            col_b = lax.broadcasted_iota(jnp.int32, (R, R), 1) // S
            s = jnp.where(row_b == col_b, s, jnp.float32(-1e30))

        # Numerically stable softmax over the last axis (exact division).
        s = s - jnp.max(s, axis=-1, keepdims=True)
        p = jnp.exp(s)
        p = p / jnp.sum(p, axis=-1, keepdims=True)

        # Weighted sum of values; padded output lanes are exactly zero.
        out = jnp.dot(p, v, preferred_element_type=jnp.float32)  # (R, HP)

        # Full 128-lane-dense store (unmasked vst); wrapper slices [:, :H].
        o_ref[...] = out.astype(o_ref.dtype)

    return attn_kernel


def _default_target_rows() -> int:
    """256-row MXU fill on v6e/v7x; 128 on v5e (4x128^2 MXU)."""
    try:
        kind = jax.devices()[0].device_kind.lower()
        if "v5 lite" in kind or "v5e" in kind or "v5lite" in kind:
            return 128
    except Exception:
        pass
    return 256


def _pick_tb(B: int, S: int, target_rows: int) -> int:
    """Largest divisor Tb of B with Tb*S <= target_rows, sublane-aligned blocks
    (Tb*S % 8 == 0) or full extent, preferring >= 2 grid steps (v7x megacore)."""
    cap = max(1, target_rows // max(S, 1))
    candidates = []
    for t in range(1, B + 1):
        if B % t != 0:
            continue
        rows_aligned = (t * S) % 8 == 0 or t == B  # sublane-aligned or full extent
        if not rows_aligned:
            continue
        if t > cap and t != 1:
            continue
        candidates.append(t)
    if not candidates:
        return B  # full-extent fallback: single grid step, block == whole array
    multi = [t for t in candidates if B // t >= 2]
    pool = multi if (B >= 2 and multi) else candidates
    return max(pool)


def self_attention_pallas(x, wq, bq, wk, bk, wv, bv):
    """x: (B, S, D) float32. Weights: (H, D) (PyTorch convention). Biases: (H,).
    Returns (B, S, H)."""
    B, S, D = x.shape
    H = wq.shape[0]
    HP = ((H + 127) // 128) * 128          # lane-padded hidden size (>= 128)
    inv_scale = 1.0 / math.sqrt(float(H))

    # Host-side fusion: pre-transposed, lane-padded (D, 3*HP) weight and (1, 3*HP) bias.
    def pad_w(w):  # (H, D) -> (D, HP), zero-padded lanes
        return jnp.pad(w.T, ((0, 0), (0, HP - H)))

    def pad_b(bvec):  # (H,) -> (HP,)
        return jnp.pad(bvec, (0, HP - H))

    w_qkv = jnp.concatenate([pad_w(wq), pad_w(wk), pad_w(wv)], axis=1)        # (D, 3*HP)
    b_qkv = jnp.concatenate([pad_b(bq), pad_b(bk), pad_b(bv)]).reshape(1, 3 * HP)

    # Pack Tb batch elements per grid step to fill MXU rows, keeping >= 2 grid steps.
    Tb = _pick_tb(B, S, _default_target_rows())
    x_flat = x.reshape(B * S, D)

    out_flat = pl.pallas_call(
        _make_attn_kernel(hidden_pad=HP, seq=S, tb=Tb, inv_scale=inv_scale),
        out_shape=jax.ShapeDtypeStruct((B * S, HP), x.dtype),
        grid_spec=pltpu.PrefetchScalarGridSpec(
            num_scalar_prefetch=0,
            grid=(B // Tb,),
            in_specs=[
                pl.BlockSpec((Tb * S, D), lambda i: (i, 0)),      # packed rows of x
                pl.BlockSpec((D, 3 * HP), lambda i: (0, 0)),      # fused, padded W (constant)
                pl.BlockSpec((1, 3 * HP), lambda i: (0, 0)),      # fused, padded bias (constant)
            ],
            out_specs=pl.BlockSpec((Tb * S, HP), lambda i: (i, 0)),  # lane-dense output
        ),
        compiler_params=pltpu.CompilerParams(
            dimension_semantics=("parallel",),
        ),
    )(x_flat, w_qkv, b_qkv)

    return out_flat[:, :H].reshape(B, S, H)


def self_attention_ref(x, wq, bq, wk, bk, wv, bv):
    """Plain-JAX reference mirroring the PyTorch forward exactly."""
    H = wq.shape[0]
    scale = jnp.sqrt(jnp.float32(H))
    xu = x[:, None, :, :]                              # unsqueeze(1) -> (B,1,S,D)
    q = jnp.einsum("bnsd,hd->bnsh", xu, wq) + bq
    k = jnp.einsum("bnsd,hd->bnsh", xu, wk) + bk
    v = jnp.einsum("bnsd,hd->bnsh", xu, wv) + bv
    att = jnp.einsum("bnqh,bnkh->bnqk", q, k) / scale
    att = jax.nn.softmax(att, axis=-1)
    out = jnp.einsum("bnqk,bnkh->bnqh", att, v)
    return out[:, 0, :, :]                             # squeeze(1) -> (B,S,H)


if __name__ == "__main__":
    B, S, D, H = 2, 8, 32, 32

    key = jax.random.PRNGKey(0)
    kx, kq, kbq, kk, kbk, kv, kbv = jax.random.split(key, 7)

    # Deterministic parameter init (PyTorch Linear-style uniform bound 1/sqrt(D))
    bound = 1.0 / math.sqrt(D)
    x = jax.random.normal(kx, (B, S, D), dtype=jnp.float32)
    wq = jax.random.uniform(kq, (H, D), jnp.float32, -bound, bound)
    bq = jax.random.uniform(kbq, (H,), jnp.float32, -bound, bound)
    wk = jax.random.uniform(kk, (H, D), jnp.float32, -bound, bound)
    bk = jax.random.uniform(kbk, (H,), jnp.float32, -bound, bound)
    wv = jax.random.uniform(kv, (H, D), jnp.float32, -bound, bound)
    bv = jax.random.uniform(kbv, (H,), jnp.float32, -bound, bound)

    out = self_attention_pallas(x, wq, bq, wk, bk, wv, bv)
    out = jax.block_until_ready(out)

    ref = self_attention_ref(x, wq, bq, wk, bk, wv, bv)
    assert out.shape == (B, S, H), out.shape
    # Exact softmax division restored -> tight f32 tolerance.
    assert jnp.allclose(out, ref, atol=1e-4, rtol=1e-4), (
        float(jnp.max(jnp.abs(out - ref)))
    )

    print("KERNEL_OK")
</pallas_src>

<mosaic_0001>
module attributes {stable_mosaic.version = 11 : i64} {
  func.func @attn_kernel(%arg0: i32, %arg1: memref<8x32xf32, #tpu.memory_space<vmem>>, %arg2: memref<32x384xf32, #tpu.memory_space<vmem>>, %arg3: memref<1x384xf32, #tpu.memory_space<vmem>>, %arg4: memref<8x128xf32, #tpu.memory_space<vmem>>) attributes {dimension_semantics = [#tpu.dimension_semantics<parallel>], iteration_bounds = array<i64: 2>, scalar_prefetch = 0 : i64, scratch_operands = 0 : i64, tpu.core_type = #tpu.core_type<tc>, window_params = [{transform_indices = @transform_0, window_bounds = array<i64: 8, 32>}, {pipeline_mode = #tpu.pipeline_mode<synchronous>, transform_indices = @transform_1, window_bounds = array<i64: 32, 384>}, {pipeline_mode = #tpu.pipeline_mode<synchronous>, transform_indices = @transform_2, window_bounds = array<i64: 1, 384>}, {transform_indices = @transform_3, window_bounds = array<i64: 8, 128>}]} {
    %c0 = arith.constant 0 : index
    %c0_0 = arith.constant 0 : index
    %0 = vector.load %arg1[%c0, %c0_0] : memref<8x32xf32, #tpu.memory_space<vmem>>, vector<8x32xf32>
    %c0_1 = arith.constant 0 : index
    %c0_2 = arith.constant 0 : index
    %1 = vector.load %arg2[%c0_1, %c0_2] : memref<32x384xf32, #tpu.memory_space<vmem>>, vector<32x384xf32>
    %c0_3 = arith.constant 0 : index
    %c0_4 = arith.constant 0 : index
    %2 = vector.load %arg3[%c0_3, %c0_4] : memref<1x384xf32, #tpu.memory_space<vmem>>, vector<1x384xf32>
    %cst = arith.constant dense<0.000000e+00> : vector<8x384xf32>
    %3 = tpu.matmul %0, %1, %cst {dimension_numbers = #tpu.dot_dimension_numbers<[1], [0], [0], [1], [0, 0, 1, 1], [], []>} : vector<8x32xf32>, vector<32x384xf32>, vector<8x384xf32> -> vector<8x384xf32>
    %4 = vector.broadcast %2 : vector<1x384xf32> to vector<8x384xf32>
    %5 = arith.addf %3, %4 : vector<8x384xf32>
    %6 = vector.extract_strided_slice %5 {offsets = [0, 0], sizes = [8, 128], strides = [1, 1]} : vector<8x384xf32> to vector<8x128xf32>
    %7 = vector.extract_strided_slice %5 {offsets = [0, 128], sizes = [8, 128], strides = [1, 1]} : vector<8x384xf32> to vector<8x128xf32>
    %8 = vector.extract_strided_slice %5 {offsets = [0, 256], sizes = [8, 128], strides = [1, 1]} : vector<8x384xf32> to vector<8x128xf32>
    %cst_5 = arith.constant dense<0.000000e+00> : vector<8x8xf32>
    %9 = tpu.matmul %6, %7, %cst_5 {dimension_numbers = #tpu.dot_dimension_numbers<[1], [1], [0], [0], [0, 0, 1, 0], [], []>} : vector<8x128xf32>, vector<8x128xf32>, vector<8x8xf32> -> vector<8x8xf32>
    %cst_6 = arith.constant 0.176776692 : f32
    %10 = vector.broadcast %cst_6 : f32 to vector<8x8xf32>
    %11 = arith.mulf %9, %10 : vector<8x8xf32>
    %cst_7 = arith.constant dense<0xFF800000> : vector<8xf32>
    %12 = vector.multi_reduction <maximumf>, %11, %cst_7 [1] : vector<8x8xf32> to vector<8xf32>
    %13 = vector.shape_cast %12 : vector<8xf32> to vector<8x1xf32>
    %14 = vector.broadcast %13 : vector<8x1xf32> to vector<8x8xf32>
    %15 = arith.subf %11, %14 : vector<8x8xf32>
    %16 = math.exp %15 : vector<8x8xf32>
    %cst_8 = arith.constant dense<0.000000e+00> : vector<8xf32>
    %17 = vector.multi_reduction <add>, %16, %cst_8 [1] : vector<8x8xf32> to vector<8xf32>
    %18 = vector.shape_cast %17 : vector<8xf32> to vector<8x1xf32>
    %19 = vector.broadcast %18 : vector<8x1xf32> to vector<8x8xf32>
    %20 = arith.divf %16, %19 : vector<8x8xf32>
    %cst_9 = arith.constant dense<0.000000e+00> : vector<8x128xf32>
    %21 = tpu.matmul %20, %8, %cst_9 {dimension_numbers = #tpu.dot_dimension_numbers<[1], [0], [0], [1], [0, 0, 1, 1], [], []>} : vector<8x8xf32>, vector<8x128xf32>, vector<8x128xf32> -> vector<8x128xf32>
    %c0_10 = arith.constant 0 : index
    %c0_11 = arith.constant 0 : index
    %22 = vector.load %arg4[%c0_10, %c0_11] : memref<8x128xf32, #tpu.memory_space<vmem>>, vector<8x128xf32>
    tpu.vector_store %arg4[%c0_10, %c0_11], %21 {strides = array<i32>} : memref<8x128xf32, #tpu.memory_space<vmem>>, vector<8x128xf32>,
    return
  }
  func.func @transform_0(%arg0: i32) -> (i32, i32) {
    %c0_i32 = arith.constant 0 : i32
    %c0_i32_0 = arith.constant 0 : i32
    return %arg0, %c0_i32 : i32, i32
  }
  func.func @transform_1(%arg0: i32) -> (i32, i32) {
    %c0_i32 = arith.constant 0 : i32
    %c0_i32_0 = arith.constant 0 : i32
    %c0_i32_1 = arith.constant 0 : i32
    return %c0_i32, %c0_i32_0 : i32, i32
  }
  func.func @transform_2(%arg0: i32) -> (i32, i32) {
    %c0_i32 = arith.constant 0 : i32
    %c0_i32_0 = arith.constant 0 : i32
    %c0_i32_1 = arith.constant 0 : i32
    return %c0_i32, %c0_i32_0 : i32, i32
  }
  func.func @transform_3(%arg0: i32) -> (i32, i32) {
    %c0_i32 = arith.constant 0 : i32
    %c0_i32_0 = arith.constant 0 : i32
    return %arg0, %c0_i32 : i32, i32
  }
}

</mosaic_0001>

<bundles_post_ra>
// kernel: tpu_custom_call.1
= control target key start
LH: loop header
LB: loop body
LE: loop exit
PB: predicated region body
PF: predicated region fallthrough
CT: control target
= control target key end

     0   :  { %8 = vsyncpa [#allocation3], 0  ;;  %s1071_s0 = inlined_call_operand.hbm [shape: f32[16,32], index: 0, kind: input, shape index: {}]   ;;  %s1072_s1 = inlined_call_operand.hbm [shape: f32[32,384], index: 1, kind: input, shape index: {}]   ;;  %s1073_s2 = inlined_call_operand.vmem [shape: f32[1,384], index: 2, kind: input, shape index: {}]   ;;  %s1074_s3 = inlined_call_operand.hbm [shape: f32[16,128], index: 3, kind: output, shape index: {}]  }
   0x1   :  { %10 = vsyncpa [#allocation3 + $0x1], 0 }
   0x2   :  { %11 = vsyncpa [#allocation6], 0 }
   0x3   :  { %12 = vsyncpa [#allocation4], 0 }
   0x4   :  { %14 = vsyncpa [#allocation4 + $0x1], 0  ;;  %s890_s12 = smov 0   ;;  %s892_s13 = smov 0  }
   0x5   :  { %s894_s14 = smov 0   ;;  %s896_s15 = smov 0  }
   0x6 LB: > { %s911_s16 = sadd.s32 4294967295, %s861_s15   ;;  %s627_s17 = sadd.s32 4294967294, %s861_s15   ;;  %s861_s15 = sphi %s896_s15, %s1096_s15   ;;  %s857_s14 = sphi %s894_s14, %s1095_s14   ;;  %s853_s13 = sphi %s892_s13, %s1094_s13   ;;  %s849_s12 = sphi %s890_s12, %s1093_s12  }
   0x7   : > { %p40_p0 = scmp.ne.s32.totalorder %s853_s13, %s849_s12  ;;  %p1075_p1 = scmp.eq.s32.totalorder %s911_s16, 0 }
   0x8   : > { %p112_p3 = scmp.eq.s32.totalorder %s627_s17, 1  ;;  %p628_p5 = scmp.ge.s32.totalorder %s861_s15, 1 }
   0x9   : > { %p920_p4 = por %p1075_p1, %p40_p0  ;;  %p119_p7 = scmp.lt.s32.totalorder %s861_s15, 3 }
   0xa   : > { %p925_p6 = por %p112_p3, %p40_p0  ;;  %s863_s21 = smov [#allocation5]  }
   0xb   : > { %s1079_s18 = scalar_select %p920_p4, 1, 0 }
   0xc   : > { %s1080_s19 = scalar_select %p925_p6, 1, 0 }
   0xd   : > { %p930_p8 = pnand %p628_p5, %p119_p7  ;;  %s131_s22 = sshll.u32 %s863_s21, 4  ;;  %s132_s22 = int_to_ptr.vmem [resolvable:$true] %s131_s22 }
   0xe   : > { %s944_s24 = sadd.s32 1, %s861_s15   ;;  %s27_s25 = sadd.s32 1, %s857_s14 }
   0xf   : > { %s1081_s20 = scalar_select %p930_p8, 1, 0 }
  0x10   : > { %p682_p9 = pneg %p930_p8  ;;  %s24_s26 = ssub.s32 %s861_s15, %s944_s24 }
  0x11   : > { %s750_s27 = scalar_lea.vmem %s132_s22, 1536  ;;  %p758_p5 = scmp.lt.s32.totalorder %s132_s22, %s132_s22 }
  0x12   : > { %p939_p11 = pnand %p682_p9, %p1075_p1  ;;  %p751_p13 = scmp.ne.s32.totalorder %s132_s22, %s750_s27 }
  0x13   : > { %p759_p7 = scmp.lt.s32.totalorder %s750_s27, %s750_s27 }
  0x14   : > { %p741_p12 = pneg %p939_p11 }
  0x15   : > { %p760_p10 = por %p759_p7, %p758_p5 }
  0x16   : > { %p753_p0 = pnand %p751_p13, %p741_p12 }
  0x18   : > { %p754_p3 = pneg %p753_p0 }
  0x1a   : > { %p761_p2 = pnand %p760_p10, %p754_p3 }
  0x1c   : > { %764 = shalt.err (!%p761_p2)
}
  0x1d   : > { %s864_s28 = smov 384   ;;  %s865_s29 = smov 24  }
  0x1e   : > { %685 = dma.hbm_to_vmem [thread:$0]  (!%p939_p11), %s1072_s1, 1536, %s132_s22, [#allocation6], %s864_s28, %s864_s28, %s865_s29  }
  0x1f   : > { %p25_p9 = scmp.eq.s32.totalorder %s24_s26, 0  ;;  %p34_p12 = scmp.ne.s32.totalorder %s857_s14, %s853_s13 }
  0x20   : > { %p35_p10 = scmp.eq.s32.totalorder %s861_s15, 0  ;;  %p695_p2 = scmp.lt.s32.totalorder %s861_s15, 2 }
  0x21   : > { %s961_s5 = scalar_select %p25_p9, %s857_s14, %s27_s25  }
  0x22   : > { %p36_p13 = por %p35_p10, %p34_p12  ;;  %p1083_p0 = scmp.eq.s32.totalorder %s911_s16, 1 }
  0x23   : > { %s148_s7 = sand.u32 1, %s857_s14   ;;  %s632_s8 = sshll.u32 %s861_s15, 7 }
  0x24   : > { %p965_p3 = por %p1083_p0, %p34_p12  ;;  %s631_s9 = sshll.u32 %s148_s7, 3 }
  0x25   : > { %s974_s17 = scalar_lea.hbm %s1071_s0, %s632_s8  ;;  %s152_s21 = scalar_lea.vmem [#allocation2], %s631_s9 }
  0x26   : > { %s1084_s6 = scalar_select %p965_p3, 1, 0 }
  0x27   : > { %s159_s22 = sshll.u32 %s152_s21, 4  ;;  %p976_p11 = pnand %p695_p2, %p36_p13  ;;  %s160_s22 = int_to_ptr.vmem [resolvable:$true] %s159_s22 }
  0x28   : > { %s149_s25 = scalar_lea.sflag [#allocation3], %s148_s7  ;;  %s765_s26 = scalar_lea.hbm %s974_s17, 128 }
  0x29   : > { %p766_p5 = scmp.ne.s32.totalorder %s974_s17, %s765_s26  ;;  %p767_p7 = pneg %p976_p11 }
  0x2a   : > { %s770_s29 = scalar_lea.hbm %s1071_s0, 256  ;;  %p771_p10 = scmp.lt.s32.totalorder %s974_s17, %s1071_s0 }
  0x2b   : > { %p768_p9 = pnand %p767_p7, %p766_p5  ;;  %p772_p2 = scmp.lt.s32.totalorder %s770_s29, %s765_s26 }
  0x2d   : > { %p769_p12 = pneg %p768_p9  ;;  %p773_p13 = por %p772_p2, %p771_p10 }
  0x2f   : > { %p774_p0 = pnand %p773_p13, %p769_p12 }
  0x31   : > { %777 = shalt.err (!%p774_p0)
}
  0x32   : > { %s778_s8 = scalar_lea.vmem %s160_s22, 128  ;;  %s866_s7 = smov [#allocation2]  }
  0x33   : > { %p779_p1 = scmp.ne.s32.totalorder %s160_s22, %s778_s8  ;;  %s783_s9 = sshll.u32 %s866_s7, 4  ;;  %s784_s9 = int_to_ptr.vmem [resolvable:$false] %s783_s9 }
  0x34   : > { %s785_s10 = scalar_lea.vmem %s784_s9, 256  ;;  %p786_p5 = scmp.lt.s32.totalorder %s160_s22, %s784_s9 }
  0x35   : > { %p781_p6 = pnand %p779_p1, %p767_p7  ;;  %p787_p9 = scmp.lt.s32.totalorder %s785_s10, %s778_s8 }
  0x37   : > { %p782_p3 = pneg %p781_p6  ;;  %p788_p4 = por %p787_p9, %p786_p5 }
  0x39   : > { %p789_p8 = pnand %p788_p4, %p782_p3 }
  0x3b   : > { %792 = shalt.err (!%p789_p8)
}
  0x3c   : > { %689 = dma.hbm_to_vmem [thread:$0]  (!%p976_p11), %s974_s17, 128, %s160_s22, %s149_s25  }
  0x3d   : > { %p1086_p12 = scmp.ne.s32.totalorder %s1081_s20, 0 }
  0x3e   : > { %s997_s11 = sand.u32 (!%p1086_p12), 1, %s853_s13   ;;  %p1087_p1 = scmp.ne.s32.totalorder (!%p1086_p12), %s1079_s18, 0 }
  0x3f   : > { %168 = sbr.rel (%p1086_p12) target bundleno = 996 (0x3e4), region = 32  ;;  %s634_s21 = sshll.u32 (!%p1086_p12), %s997_s11, 3 }
  0x40   : > { %s171_s26 = scalar_lea.sflag (!%p1086_p12), [#allocation3], %s997_s11  ;;  %s174_s27 = scalar_lea.vmem (!%p1086_p12), [#allocation2], %s634_s21 }
  0x44   : > { %836 = dma.done.wait (%p1087_p1), %s171_s26, 128  }
  0x45   : > { %838 = vsyncadd (%p1087_p1), %s171_s26, 4294967168  ;;  %p1088_p4 = scmp.eq.s32.totalorder %s911_s16, 0 }
  0x47   : > { %840 = dma.done.wait (%p1088_p4), [#allocation6], 1536   ;;  %p1089_p6 = pmov %p1088_p4 }
  0x48   : > { %v867_v0 = vmov 0.0   ;;  %v212_v1 = vld [vmem:[#allocation5 + $0x50] sm:$0xff]  ;;  %v211_v2 = vld [vmem:[#allocation5 + $0x48] sm:$0xff]  ;;  %v209_v3 = vld [vmem:[#allocation5 + $0x38] sm:$0xff]  ;;  %vm231_vm0 = vcmask 261120   ;;  %vm868_vm1 = vmmov 0   ;;  %v216_v10 = vlaneseq }
  0x49   : > { %842 = vsyncadd (%p1089_p6), [#allocation6], 4294965760  ;;  %299 = vmatprep.mubr.f32.mxu0 %v867_v0  ;;  %653 = vmatprep.subr.mxu1 %v867_v0  ;;  %v208_v4 = vld [vmem:[#allocation5 + $0x30] sm:$0xff]  ;;  %v206_v5 = vld [vmem:[#allocation5 + $0x20] sm:$0xff]  ;;  %vm447_vm2 = vcmask 64512   ;;  %s200_s17 = scalar_lea.vmem [#allocation7], %s634_s21 }
  0x4a   : > { %259 = vmatprep.subr.mxu0 %v212_v1  ;;  %v205_v6 = vld [vmem:[#allocation5 + $0x18] sm:$0xff]  ;;  %v203_v7 = vld [vmem:[#allocation5 + $0x8] sm:$0xff]  ;;  %v202_v8 = vld [vmem:[#allocation5] sm:$0xff]  ;;  %661 = vmatprep.mubr.msk.f32.mxu1 %vm868_vm1, %v867_v0  ;;  %v217_v11 = vshrl.u32 %v216_v10, 7  ;;  %s547_s22 = sshll.u32 %s200_s17, 4  ;;  %s641_s23 = sshll.u32 %s911_s16, 7  ;;  %s1025_s22 = int_to_ptr.vmem [resolvable:$true] %s547_s22 }
  0x4b   : > { %260 = vmatpush1.msra.mxu0 %v211_v2  ;;  %v201_v9 = vld [vmem:[%s174_s27] sm:$0xff]  ;;  %v210_v22 = vld [vmem:[#allocation5 + $0x40] sm:$0xff]  ;;  %v207_v23 = vld [vmem:[#allocation5 + $0x28] sm:$0xff]  ;;  %s1030_s29 = scalar_lea.hbm %s1074_s3, %s641_s23  ;;  %s534_s30 = scalar_lea.sflag [#allocation4], %s997_s11 }
  0x4c   : > { %261 = vmatprep.subr.mxu0 %v209_v3  ;;  %v222_v12 = vsub.s32 1, %v217_v11  ;;  %v214_v13 = vld [vmem:[%s1073_s2] sm:$0x7]  ;;  %v218_v14 = vsub.s32 0, %v217_v11  ;;  %v213_v21 = vld [vmem:[#allocation5 + $0x58] sm:$0xff]  ;;  %v226_v34 = vsub.s32 2, %v217_v11 }
  0x4d   : > { %262 = vmatpush1.msra.mxu0 %v208_v4  ;;  %654 = vmatpush3.msra.mxu1 %v213_v21  ;;  %v204_v24 = vld [vmem:[#allocation5 + $0x10] sm:$0xff]  ;;  %s793_s4 = scalar_lea.vmem %s1025_s22, 128  ;;  %p1090_p3 = scmp.ne.s32.totalorder %s1084_s6, 0 }
  0x4e   : > { %263 = vmatprep.subr.mxu0 %v206_v5  ;;  %v223_v15 = vrot.slane %v214_v13, %v222_v12  ;;  %v219_v17 = vrot.slane %v214_v13, %v218_v14  ;;  %655 = vmatprep.subr.mxu1 %v867_v0  ;;  %v227_v36 = vrot.slane %v214_v13, %v226_v34  ;;  %p794_p8 = scmp.ne.s32.totalorder %s1025_s22, %s793_s4  ;;  %s869_s16 = smov [#allocation7]  }
  0x4f   : > { %264 = vmatpush1.msra.mxu0 %v205_v6  ;;  %656 = vmatpush3.msra.mxu1 %v210_v22  ;;  %s797_s8 = sshll.u32 %s869_s16, 4  ;;  %s798_s8 = int_to_ptr.vmem [resolvable:$false] %s797_s8 }
  0x50   : > { %265 = vmatprep.subr.mxu0 %v203_v7  ;;  %657 = vmatprep.subr.mxu1 %v867_v0  ;;  %p795_p11 = pnand %p794_p8, %p1090_p3  ;;  %s799_s7 = scalar_lea.vmem %s798_s8, 256 }
  0x51   : > { %266 = vmatpush1.msra.mxu0 %v202_v8  ;;  %658 = vmatpush3.msra.mxu1 %v207_v23  ;;  %p800_p10 = scmp.lt.s32.totalorder %s1025_s22, %s798_s8  ;;  %p801_p2 = scmp.lt.s32.totalorder %s799_s7, %s793_s4 }
  0x52   : > { %637 = vmatmul.mubr.msk.f32.vlgmr.msra.gmra.mxu0 %vm231_vm0, %v201_v9  ;;  %664 = vmatprep.subr.mxu0 %v867_v0  ;;  %p796_p7 = pneg %p795_p11 }
  0x53   : > { %666 = vmatprep.mubr.msk.f32.mxu0 %vm868_vm1, %v867_v0  ;;  %659 = vmatprep.subr.mxu1 %v867_v0  ;;  %p802_p13 = por %p801_p2, %p800_p10 }
  0x54   : > { %660 = vmatpush3.msra.mxu1 %v204_v24 }
  0x55   : > { %662 = vmatmul.mubr.msk.f32.vlgmr.msra.gmra.mxu1 %vm231_vm0, %v201_v9  ;;  %669 = vmatprep.subr.mxu1 %v867_v0  ;;  %p803_p0 = pnand %p802_p13, %p796_p7 }
  0x56   : > { %671 = vmatprep.mubr.msk.f32.mxu1 %vm868_vm1, %v867_v0 }
 0x112   : > { %v301_v16 = vpop.f32.mrf.mxu0 }
 0x113   : > { %v302_v20 = vadd.f32 %v301_v16, %v219_v17 }
 0x114   : > { %v303_v18 = vpop.f32.mrf.mxu0 }
 0x115   : > { %v304_v19 = vadd.f32 %v303_v18, %v223_v15  ;;  %v372_v35 = vpop.f32.mrf.mxu1 }
 0x116   : > { %v373_v38 = vadd.f32 %v372_v35, %v227_v36 }
 0x117   : > { %665 = vmatpush3.xpose.msra.mxu0 %v304_v19  ;;  %v663_v37 = vpop.f32.mrf.mxu1 }
 0x118   : > { %670 = vmatpush3.msra.mxu1 %v373_v38 }
 0x11a   : > { %667 = vmatmul.mubr.f32.vlgmr.msra.gmra.mxu0 %v302_v20 }
 0x1da   : > { %v442_v25 = vpop.f32.mrf.mxu0 }
 0x1db   : > { %v446_v26 = vmul.f32 0.17677669, %v442_v25 }
 0x1dc   : > { %v668_v27 = vpop.f32.mrf.mxu0 }
 0x1dd   : > { %v448_v28 = vsel %vm447_vm2, %v446_v26, -inf }
 0x1de   : > { %449 = vmax.xlane.f32.xlu0 %v448_v28 }
 0x267   : > { %v450_v29 = vpop.xlane.xlu0 %449 }
 0x268   : > { %v451_v30 = vsub.f32 %v446_v26, %v450_v29 }
 0x26a   : > { %v452_v31 = vmul.f32 1.442695, %v451_v30 }
 0x26c   : > { %735 = vpow2.f32 %v452_v31 }
 0x279   : > { %v736_v32 = vpop.eup %735 }
 0x27a   : > { %v454_v33 = vsel %vm447_vm2, %v736_v32, 0.0 }
 0x27b   : > { %455 = vadd.xlane.f32.xlu0 %v454_v33 }
 0x304   : > { %v456_v39 = vpop.xlane.xlu0 %455 }
 0x305   : > { %737 = vrcp.f32 %v456_v39 }
 0x312   : > { %v738_v40 = vpop.eup %737 }
 0x313   : > { %v458_v41 = vmul.f32 %v738_v40, %v736_v32 }
 0x315   : > { %672 = vmatmul.mubr.msk.f32.vlgmr.msra.gmra.mxu1 %vm447_vm2, %v458_v41 }
 0x3d5   : > { %v528_v42 = vpop.f32.mrf.mxu1 }
 0x3d6   : > { %532 = vst [vmem:[%s200_s17] sm:$0xff] %v528_v42 }
 0x3d7   : > { %v673_v43 = vpop.f32.mrf.mxu1 }
 0x3d8   : > { %806 = shalt.err (!%p803_p0)
}
 0x3d9   : > { %s807_s9 = scalar_lea.hbm %s1030_s29, 128  ;;  %s811_s21 = scalar_lea.hbm %s1074_s3, 256 }
 0x3da   : > { %p808_p5 = scmp.ne.s32.totalorder %s1030_s29, %s807_s9  ;;  %p812_p1 = scmp.lt.s32.totalorder %s1030_s29, %s1074_s3 }
 0x3db   : > { %p813_p4 = scmp.lt.s32.totalorder %s811_s21, %s807_s9 }
 0x3dc   : > { %p809_p9 = pnand %p808_p5, %p1090_p3 }
 0x3dd   : > { %p814_p6 = por %p813_p4, %p812_p1 }
 0x3de   : > { %p810_p12 = pneg %p809_p9 }
 0x3e0   : > { %p815_p8 = pnand %p814_p6, %p810_p12 }
 0x3e2   : > { %818 = shalt.err (!%p815_p8)
}
 0x3e3   : > { %680 = dma.vmem_to_hbm [thread:$0]  (%p1090_p3), %s1025_s22, 128, %s1030_s29, %s534_s30  }
 0x3e4 PF: > { %s559_s18 = sand.u32 1, %s849_s12   ;;  %p1091_p11 = scmp.ne.s32.totalorder %s1080_s19, 0 }
 0x3e5   : > { %p1092_p7 = scmp.ge.s32.totalorder %s861_s15, 2  ;;  %s560_s20 = scalar_lea.sflag [#allocation4], %s559_s18 }
 0x3e7   : > { %p691_p10 = pnand %p1092_p7, %p1091_p11 }
 0x3e9   : > { %p692_p2 = pneg %p691_p10 }
 0x3eb   : > { %844 = dma.done.wait (%p692_p2), %s560_s20, 128  }
 0x3ec   : > { %846 = vsyncadd (%p692_p2), %s560_s20, 4294967168  ;;  %p17_p13 = scmp.ge.s32.totalorder %s944_s24, 4   ;;  %s1093_s12 = smov %s853_s13 }
 0x3ed   : > { %s1094_s13 = smov %s857_s14  ;;  %s1095_s14 = smov %s961_s5 }
 0x3ee   : > { %s1096_s15 = smov %s944_s24  ;;  %19 = sbr.rel (!%p17_p13) target bundleno = 6 (0x6), region = 81 }
 0x3f3   :  { %565 = vsyncpa [#allocation3], 1 }
 0x3f4   :  { %567 = vsyncpa [#allocation3 + $0x1], 1 }
 0x3f5   :  { %568 = vsyncpa [#allocation6], 1 }
 0x3f6   :  { %569 = vsyncpa [#allocation4], 1 }
 0x3f7   :  { %571 = vsyncpa [#allocation4 + $0x1], 1 }

</bundles_post_ra>
